<compile_context>
chip_gen: v7x
topology: tpu7x:2x2x1
jax: 0.10.0
libtpu: 0.0.40
codegen_flags: <defaults>
</compile_context>

<pallas_src>
import functools
import numpy as np
import jax
import jax.numpy as jnp
from jax.experimental import pallas as pl
from jax.experimental.pallas import tpu as pltpu


# ----------------------------------------------------------------------------
# Host-side glue: dependency-tree path extraction -> dense path masks.
# heads[i] = 0-based parent index of token i, root has head == -1.
# TODO(synk): creatTree / find_sentence_sub_paths are data-dependent Python
# tree walks; they are reproduced host-side as dense path masks.
# ----------------------------------------------------------------------------
def _ancestor_chain(head, i):
    chain = [i]
    while head[chain[-1]] != -1:
        chain.append(head[chain[-1]])
    return chain


def build_path_masks(heads, predicates, max_length):
    """mask[b, i, l] == 1 iff position l lies on the left/right sub-path of
    word i in sentence b.  Rows for padding words are all zero."""
    B = len(heads)
    maskL = np.zeros((B, max_length, max_length), dtype=np.int8)
    maskR = np.zeros((B, max_length, max_length), dtype=np.int8)
    paths = []  # kept for the pure-numpy reference check
    for b, head in enumerate(heads):
        p = int(predicates[b])
        anc_p = _ancestor_chain(head, p)
        anc_p_set = set(anc_p)
        sent_paths = []
        for i in range(len(head)):
            anc_i = _ancestor_chain(head, i)
            lca = next(n for n in anc_i if n in anc_p_set)
            left = anc_i[: anc_i.index(lca) + 1]
            right = anc_p[: anc_p.index(lca) + 1]
            maskL[b, i, left] = 1
            maskR[b, i, right] = 1
            sent_paths.append((left, right))
        paths.append(sent_paths)
    return maskL, maskR, paths


def _round_up(n, m):
    return ((n + m - 1) // m) * m


def _has_bf16_valu():
    """bf16 VALU exists on v6e and later; v2-v5 (incl. v5e/v5p) do not."""
    try:
        kind = jax.devices()[0].device_kind.lower()
    except Exception:
        return False
    if "tpu" not in kind:
        return False
    return not any(tag in kind for tag in ("v2", "v3", "v4", "v5"))


def _choose_tq(B, L8, H_pad, x_dtype, budget_bytes):
    """Size the query tile against the REAL VMEM residents only (the fused
    select/max stream is not materialized): x block, bf16 bias block and the
    output block, each double-buffered."""
    x_bytes = jnp.dtype(x_dtype).itemsize

    def resident(tq):
        lp = _round_up(L8, tq)
        x_blk = 2 * lp * H_pad * x_bytes          # resident x, 2 buffers
        b_blk = 2 * 2 * tq * lp * 2               # bf16 bias, 2 buffers
        o_blk = 2 * tq * 2 * H_pad * x_bytes      # output, 2 buffers
        return x_blk + b_blk + o_blk

    tq = max(8, min(_round_up(L8, 8), 256))
    tq = (tq // 8) * 8
    while tq > 8 and resident(tq) > budget_bytes:
        tq = max(8, ((tq // 2) // 8) * 8)
    # Keep >= 2 grid steps in total so both v7x TensorCores get work.
    while tq > 8 and B * (_round_up(L8, tq) // tq) < 2:
        tq = max(8, ((tq // 2) // 8) * 8)
    return tq


# ----------------------------------------------------------------------------
# Pallas kernel: fused masked max-pool (left & right paths) for one query tile.
#   x_ref : [L, H]       activations (resident across query tiles of a batch)
#   b_ref : [2, TQ, L]   bf16 additive path bias (0 on-path, -inf off-path)
#   o_ref : [TQ, 2H]     pooled left || pooled right
# ----------------------------------------------------------------------------
def encoder_sdp_kernel(x_ref, b_ref, o_ref, *, compute_dtype, h_pad):
    cd = compute_dtype
    x = x_ref[...].astype(cd)                       # [L, H]
    bias = b_ref[...].astype(cd)                    # [2, TQ, L]
    # One fused add + max reduction for both halves: [2, TQ, L, H] -> [2, TQ, H].
    s = x[None, None, :, :] + bias[:, :, :, None]
    pooled = jnp.max(s, axis=2)
    # Empty path (padding word) pools to -inf -> emit zeros, matching the zero
    # rows appended in the PyTorch forward.  (A row whose on-path features are
    # all exactly -inf would also be zeroed; harmless for real activations.)
    neg = jnp.array(-jnp.inf, dtype=cd)
    pooled = jnp.where(pooled == neg, jnp.zeros_like(pooled), pooled)
    # Lane-aligned slice stores (h_pad is a multiple of 128); no concatenate.
    o_ref[:, :h_pad] = pooled[0].astype(o_ref.dtype)
    o_ref[:, h_pad:] = pooled[1].astype(o_ref.dtype)


def encoder_sdp_forward(inputs, maskL, maskR, hidden_size, *, tq=None,
                        vmem_budget_bytes=24 * 1024 * 1024):
    """inputs: [B, L, H]; maskL/maskR: [B, L, L] (0/1 path membership).
    Returns [B, L, 2*hidden_size] in inputs.dtype."""
    B, L, H = inputs.shape
    assert hidden_size == H, "module requires hidden_size == input feature dim"

    H_pad = _round_up(H, 128)
    L8 = _round_up(max(L, 8), 8)

    # bf16 compute only when it is exact (bf16 inputs) AND the chip has a bf16
    # VALU (v6e / v7x); otherwise f32 (v5e and older keep the f32 path).
    compute_dtype = (jnp.bfloat16
                     if (inputs.dtype == jnp.bfloat16 and _has_bf16_valu())
                     else jnp.float32)

    if tq is None:
        tq = _choose_tq(B, L8, H_pad, inputs.dtype, vmem_budget_bytes)
    tq = max(8, _round_up(int(tq), 8))
    L_pad = _round_up(L8, tq)

    x = jnp.pad(inputs, ((0, 0), (0, L_pad - L), (0, H_pad - H)))

    # Stack left/right masks into one bf16 additive-bias stream: 0 on-path,
    # -inf off-path.  Padding (both query rows and sentence positions) is -inf.
    mask2 = jnp.stack([jnp.asarray(maskL), jnp.asarray(maskR)], axis=1)  # [B,2,L,L]
    bias = jnp.where(mask2 > 0, 0.0, -jnp.inf).astype(jnp.bfloat16)
    bias = jnp.pad(bias, ((0, 0), (0, 0), (0, L_pad - L), (0, L_pad - L)),
                   constant_values=-jnp.inf)

    kernel = functools.partial(encoder_sdp_kernel,
                               compute_dtype=compute_dtype, h_pad=H_pad)

    out = pl.pallas_call(
        kernel,
        out_shape=jax.ShapeDtypeStruct((B, L_pad, 2 * H_pad), inputs.dtype),
        grid=(B, L_pad // tq),
        in_specs=[
            # x: full sentence block, constant in the query-tile axis
            # (stays VMEM-resident across query tiles of the same batch).
            pl.BlockSpec((None, L_pad, H_pad), lambda b, q: (b, 0, 0)),
            # stacked bf16 path bias: one query tile per step.
            pl.BlockSpec((None, 2, tq, L_pad), lambda b, q: (b, 0, q, 0)),
        ],
        out_specs=pl.BlockSpec((None, tq, 2 * H_pad), lambda b, q: (b, q, 0)),
        compiler_params=pltpu.CompilerParams(
            dimension_semantics=("parallel", "parallel"),
            vmem_limit_bytes=32 * 1024 * 1024,   # safe on v7x's 64 MiB VMEM
        ),
    )(x, bias)

    if L_pad == L and H_pad == H:
        return out.reshape(B, L, 2 * H)
    # Single strided-slice strip (+ free reshapes) instead of a two-slice
    # concatenate: one HBM pass over the output.
    return out[:, :L].reshape(B, L, 2, H_pad)[..., :H].reshape(B, L, 2 * H)


# ----------------------------------------------------------------------------
# Pure-numpy reference (mirrors the PyTorch forward with the same path defs).
# ----------------------------------------------------------------------------
def reference_forward(inputs_f32, paths, max_length, hidden_size):
    B, L, H = inputs_f32.shape
    out = np.zeros((B, max_length, 2 * hidden_size), dtype=np.float32)
    for b, sent_paths in enumerate(paths):
        for i, (left, right) in enumerate(sent_paths):
            out[b, i, :H] = inputs_f32[b, left].max(axis=0)
            out[b, i, H:] = inputs_f32[b, right].max(axis=0)
    return out


if __name__ == "__main__":
    B, L, H = 2, 16, 32
    hidden_size = H  # EncoderSDP consistency: output width = 2 * hidden_size

    key = jax.random.PRNGKey(0)
    # bf16 activations: max-pool (and the +0 path bias) is exact in bf16, so the
    # kernel matches a reference built from the same bf16-rounded inputs.  This
    # is bf16-faithful (not f32-faithful to the original fp32 PyTorch module).
    inputs = jax.random.normal(key, (B, L, H), dtype=jnp.float32).astype(jnp.bfloat16)

    # Dependency trees (0-based parent index, root = -1); both sentences are
    # shorter than max_length to exercise the zero-padding branch.
    heads = [
        [-1, 0, 1, 1, 0, 4, 4, 2, 7, 0, 9, 9],   # length 12
        [2, 2, -1, 2, 3, 3, 5, 5, 2],            # length 9
    ]
    predicates = np.array([3, 4], dtype=np.int32)

    maskL_np, maskR_np, paths = build_path_masks(heads, predicates, L)

    inputs_f32 = np.asarray(inputs.astype(jnp.float32))
    ref = reference_forward(inputs_f32, paths, L, hidden_size)

    # 1) auto-sized query tile (full sentence per grid step at these shapes).
    out = jax.block_until_ready(
        encoder_sdp_forward(inputs, maskL_np, maskR_np, hidden_size))
    np.testing.assert_allclose(np.asarray(out.astype(jnp.float32)), ref,
                               rtol=1e-6, atol=1e-6)

    # 2) forced small tile to exercise the multi-tile query grid path.
    out_tiled = jax.block_until_ready(
        encoder_sdp_forward(inputs, maskL_np, maskR_np, hidden_size, tq=8))
    np.testing.assert_allclose(np.asarray(out_tiled.astype(jnp.float32)), ref,
                               rtol=1e-6, atol=1e-6)

    print("KERNEL_OK")
</pallas_src>

<mosaic_0001>
module attributes {stable_mosaic.version = 11 : i64} {
  func.func @encoder_sdp_kernel(%arg0: i32, %arg1: i32, %arg2: memref<1x16x128xbf16, #tpu.memory_space<vmem>>, %arg3: memref<1x2x16x16xbf16, #tpu.memory_space<vmem>>, %arg4: memref<1x16x256xbf16, #tpu.memory_space<vmem>>) attributes {dimension_semantics = [#tpu.dimension_semantics<parallel>, #tpu.dimension_semantics<parallel>], iteration_bounds = array<i64: 2, 1>, scalar_prefetch = 0 : i64, scratch_operands = 0 : i64, tpu.core_type = #tpu.core_type<tc>, window_params = [{transform_indices = @transform_0, window_bounds = array<i64: 1, 16, 128>}, {transform_indices = @transform_1, window_bounds = array<i64: 1, 2, 16, 16>}, {transform_indices = @transform_2, window_bounds = array<i64: 1, 16, 256>}]} {
    %c0 = arith.constant 0 : index
    %c0_0 = arith.constant 0 : index
    %c0_1 = arith.constant 0 : index
    %0 = vector.load %arg2[%c0, %c0_0, %c0_1] : memref<1x16x128xbf16, #tpu.memory_space<vmem>>, vector<1x16x128xbf16>
    %1 = vector.shape_cast %0 : vector<1x16x128xbf16> to vector<16x128xbf16>
    %2 = arith.extf %1 : vector<16x128xbf16> to vector<16x128xf32>
    %c0_2 = arith.constant 0 : index
    %c0_3 = arith.constant 0 : index
    %c0_4 = arith.constant 0 : index
    %c0_5 = arith.constant 0 : index
    %3 = vector.load %arg3[%c0_2, %c0_3, %c0_4, %c0_5] : memref<1x2x16x16xbf16, #tpu.memory_space<vmem>>, vector<1x2x16x16xbf16>
    %4 = vector.shape_cast %3 : vector<1x2x16x16xbf16> to vector<2x16x16xbf16>
    %5 = arith.extf %4 : vector<2x16x16xbf16> to vector<2x16x16xf32>
    %6 = vector.shape_cast %2 : vector<16x128xf32> to vector<1x1x16x128xf32>
    %7 = vector.shape_cast %5 : vector<2x16x16xf32> to vector<2x16x16x1xf32>
    %8 = vector.broadcast %6 : vector<1x1x16x128xf32> to vector<2x16x16x128xf32>
    %9 = vector.broadcast %7 : vector<2x16x16x1xf32> to vector<2x16x16x128xf32>
    %10 = arith.addf %8, %9 : vector<2x16x16x128xf32>
    %cst = arith.constant dense<0xFF800000> : vector<2x16x128xf32>
    %11 = vector.multi_reduction <maximumf>, %10, %cst [2] : vector<2x16x16x128xf32> to vector<2x16x128xf32>
    %cst_6 = arith.constant 0xFF800000 : f32
    %12 = vector.broadcast %cst_6 : f32 to vector<2x16x128xf32>
    %13 = arith.cmpf oeq, %11, %12 : vector<2x16x128xf32>
    %cst_7 = arith.constant 0.000000e+00 : f32
    %14 = vector.broadcast %cst_7 : f32 to vector<2x16x128xf32>
    %15 = arith.select %13, %14, %11 : vector<2x16x128xi1>, vector<2x16x128xf32>
    %16 = vector.extract_strided_slice %15 {offsets = [0, 0, 0], sizes = [1, 16, 128], strides = [1, 1, 1]} : vector<2x16x128xf32> to vector<1x16x128xf32>
    %17 = vector.shape_cast %16 : vector<1x16x128xf32> to vector<16x128xf32>
    %18 = arith.truncf %17 : vector<16x128xf32> to vector<16x128xbf16>
    %c0_8 = arith.constant 0 : index
    %c0_9 = arith.constant 0 : index
    %c0_10 = arith.constant 0 : index
    %19 = vector.load %arg4[%c0_8, %c0_9, %c0_10] : memref<1x16x256xbf16, #tpu.memory_space<vmem>>, vector<1x16x128xbf16>
    %20 = vector.shape_cast %19 : vector<1x16x128xbf16> to vector<16x128xbf16>
    %21 = vector.shape_cast %18 : vector<16x128xbf16> to vector<1x16x128xbf16>
    tpu.vector_store %arg4[%c0_8, %c0_9, %c0_10], %21 {strides = array<i32>} : memref<1x16x256xbf16, #tpu.memory_space<vmem>>, vector<1x16x128xbf16>,
    %22 = vector.extract_strided_slice %15 {offsets = [1, 0, 0], sizes = [1, 16, 128], strides = [1, 1, 1]} : vector<2x16x128xf32> to vector<1x16x128xf32>
    %23 = vector.shape_cast %22 : vector<1x16x128xf32> to vector<16x128xf32>
    %24 = arith.truncf %23 : vector<16x128xf32> to vector<16x128xbf16>
    %c0_11 = arith.constant 0 : index
    %c0_12 = arith.constant 0 : index
    %c128 = arith.constant 128 : index
    %25 = vector.load %arg4[%c0_11, %c0_12, %c128] : memref<1x16x256xbf16, #tpu.memory_space<vmem>>, vector<1x16x128xbf16>
    %26 = vector.shape_cast %25 : vector<1x16x128xbf16> to vector<16x128xbf16>
    %27 = vector.shape_cast %24 : vector<16x128xbf16> to vector<1x16x128xbf16>
    tpu.vector_store %arg4[%c0_11, %c0_12, %c128], %27 {strides = array<i32>} : memref<1x16x256xbf16, #tpu.memory_space<vmem>>, vector<1x16x128xbf16>,
    return
  }
  func.func @transform_0(%arg0: i32, %arg1: i32) -> (i32, i32, i32) {
    %c0_i32 = arith.constant 0 : i32
    %c0_i32_0 = arith.constant 0 : i32
    %c0_i32_1 = arith.constant 0 : i32
    return %arg0, %c0_i32, %c0_i32_0 : i32, i32, i32
  }
  func.func @transform_1(%arg0: i32, %arg1: i32) -> (i32, i32, i32, i32) {
    %c0_i32 = arith.constant 0 : i32
    %c0_i32_0 = arith.constant 0 : i32
    %c0_i32_1 = arith.constant 0 : i32
    return %arg0, %c0_i32, %arg1, %c0_i32_0 : i32, i32, i32, i32
  }
  func.func @transform_2(%arg0: i32, %arg1: i32) -> (i32, i32, i32) {
    %c0_i32 = arith.constant 0 : i32
    %c0_i32_0 = arith.constant 0 : i32
    return %arg0, %arg1, %c0_i32 : i32, i32, i32
  }
}

</mosaic_0001>

<bundles_post_ra>
// kernel: tpu_custom_call.1
= control target key start
LH: loop header
LB: loop body
LE: loop exit
PB: predicated region body
PF: predicated region fallthrough
CT: control target
= control target key end

     0   :  { %7 = vsyncpa [#allocation3], 0  ;;  %s2026_s0 = inlined_call_operand.hbm [shape: bf16[2,16,128], index: 0, kind: input, shape index: {}]   ;;  %s2027_s1 = inlined_call_operand.hbm [shape: bf16[2,2,16,16], index: 1, kind: input, shape index: {}]   ;;  %s2028_s2 = inlined_call_operand.hbm [shape: bf16[2,16,256], index: 2, kind: output, shape index: {}]  }
   0x1   :  { %9 = vsyncpa [#allocation3 + $0x1], 0 }
   0x2   :  { %10 = vsyncpa [#allocation6], 0 }
   0x3   :  { %12 = vsyncpa [#allocation6 + $0x1], 0 }
   0x4   :  { %13 = vsyncpa [#allocation4], 0 }
   0x5   :  { %15 = vsyncpa [#allocation4 + $0x1], 0  ;;  %s1612_s9 = smov 0   ;;  %s1614_s10 = smov 0  }
   0x6   :  { %s1616_s11 = smov 0   ;;  %s1618_s12 = smov 0  }
   0x7   :  { %s1620_s13 = smov 0   ;;  %s1622_s14 = smov 0  }
   0x8 LB: > { %s1272_s15 = sadd.s32 4294967295, %s1588_s14   ;;  %s1273_s16 = sadd.s32 4294967294, %s1588_s14   ;;  %s1588_s14 = sphi %s1622_s14, %s21_s14   ;;  %s1584_s13 = sphi %s1620_s13, %s2046_s13   ;;  %s1580_s12 = sphi %s1618_s12, %s2045_s12   ;;  %s1576_s11 = sphi %s1616_s11, %s2044_s11   ;;  %s1572_s10 = sphi %s1614_s10, %s2043_s10   ;;  %s1568_s9 = sphi %s1612_s9, %s2042_s9  }
   0x9   : > { %s33_s17 = sadd.s32 1, %s1584_s13  ;;  %s40_s18 = sadd.s32 1, %s1576_s11 }
   0xa   : > { %p35_p0 = scmp.ge.s32.totalorder %s33_s17, 2  ;;  %p47_p1 = scmp.ne.s32.totalorder %s1576_s11, %s1572_s10 }
   0xb   : > { %p48_p2 = scmp.eq.s32.totalorder %s1588_s14, 0  ;;  %p53_p3 = scmp.ne.s32.totalorder %s1572_s10, %s1568_s9 }
   0xc   : > { %s2048_s17 = smov (%p35_p0, %s33_s17), 0  ;;  %p54_p5 = scmp.eq.s32.totalorder %s1272_s15, 0 }
   0xd   : > { %p1653_p4 = por %p48_p2, %p47_p1  ;;  %s37_s20 = ssub.s32 %s1584_s13, %s2048_s17 }
   0xe   : > { %p107_p6 = scmp.eq.s32.totalorder %s1272_s15, 1  ;;  %p38_p7 = scmp.eq.s32.totalorder %s37_s20, 0 }
   0xf   : > { %p1659_p8 = por %p54_p5, %p53_p3  ;;  %p113_p10 = scmp.eq.s32.totalorder %s1273_s16, 1 }
  0x10   : > { %p1663_p9 = por %p107_p6, %p47_p1  ;;  %p1388_p13 = scmp.lt.s32.totalorder %s1588_s14, 2 }
  0x11   : > { %s2032_s21 = scalar_select %p1659_p8, 1, 0 }
  0x12   : > { %s2033_s22 = scalar_select %p1663_p9, 1, 0 }
  0x13   : > { %s1668_s23 = scalar_select %p38_p7, %s1576_s11, %s40_s18  }
  0x14   : > { %p1670_p11 = por %p113_p10, %p53_p3  ;;  %s1677_s25 = sand.u32 1, %s1576_s11  }
  0x15   : > { %s1276_s26 = sshll.u32 %s1677_s25, 3  ;;  %s1323_s27 = sshll.u32 %s1584_s13, 7 }
  0x16   : > { %s2034_s24 = scalar_select %p1670_p11, 1, 0 }
  0x17   : > { %s1684_s30 = scalar_lea.hbm %s2026_s0, %s1323_s27  ;;  %s137_s3 = scalar_lea.vmem [#allocation2], %s1276_s26 }
  0x18   : > { %s144_s4 = sshll.u32 %s137_s3, 4  ;;  %p1690_p0 = pnand %p1388_p13, %p1653_p4  ;;  %s1686_s4 = int_to_ptr.vmem [resolvable:$true] %s144_s4 }
  0x19   : > { %s134_s6 = scalar_lea.sflag [#allocation3], %s1677_s25  ;;  %s1442_s7 = scalar_lea.hbm %s1684_s30, 128 }
  0x1a   : > { %p1443_p2 = scmp.ne.s32.totalorder %s1684_s30, %s1442_s7  ;;  %p1444_p3 = pneg %p1690_p0 }
  0x1b   : > { %s1447_s16 = scalar_lea.hbm %s2026_s0, 256  ;;  %p1448_p4 = scmp.lt.u32.totalorder %s1684_s30, %s2026_s0 }
  0x1c   : > { %p1445_p5 = pnand %p1444_p3, %p1443_p2  ;;  %p1449_p7 = scmp.lt.u32.totalorder %s1447_s16, %s1442_s7 }
  0x1d   : > { %p1451_p13 = scmp.lt.u32.totalorder %s1442_s7, %s1684_s30 }
  0x1e   : > { %p1446_p6 = pneg %p1445_p5  ;;  %p1450_p10 = por %p1449_p7, %p1448_p4 }
  0x20   : > { %p1452_p12 = por %p1451_p13, %p1450_p10 }
  0x22   : > { %p1453_p1 = pnand %p1452_p12, %p1446_p6 }
  0x24   : > { %1456 = shalt.err (!%p1453_p1)
}
  0x25   : > { %s1457_s20 = scalar_lea.vmem %s1686_s4, 128  ;;  %s1590_s26 = smov [#allocation2]  }
  0x26   : > { %p1458_p2 = scmp.ne.s32.totalorder %s1686_s4, %s1457_s20  ;;  %s1462_s27 = sshll.u32 %s1590_s26, 4  ;;  %s1463_s27 = int_to_ptr.vmem [resolvable:$false] %s1462_s27 }
  0x27   : > { %s1464_s28 = scalar_lea.vmem %s1463_s27, 256  ;;  %p1465_p9 = scmp.lt.s32.totalorder %s1686_s4, %s1463_s27 }
  0x28   : > { %p1460_p5 = pnand %p1458_p2, %p1444_p3  ;;  %p1466_p4 = scmp.lt.s32.totalorder %s1464_s28, %s1457_s20 }
  0x2a   : > { %p1461_p11 = pneg %p1460_p5  ;;  %p1467_p7 = por %p1466_p4, %p1465_p9 }
  0x2c   : > { %p1468_p10 = pnand %p1467_p7, %p1461_p11 }
  0x2e   : > { %1471 = shalt.err (!%p1468_p10)
}
  0x2f   : > { %s1591_s29 = smov 64   ;;  %s1592_s3 = smov 4  }
  0x30   : > { %1380 = dma.hbm_to_vmem [thread:$0]  (!%p1690_p0), %s1684_s30, 128, %s1686_s4, %s134_s6, %s1591_s29, %s1591_s29, %s1592_s3  }
  0x31   : > { %p175_p9 = scmp.lt.s32.totalorder %s1588_s14, 3  ;;  %s1279_s7 = sshll.u32 %s1677_s25, 4 }
  0x32   : > { %s1324_s8 = sshll.u32 %s1584_s13, 8  ;;  %p2036_p11 = scmp.ge.s32.totalorder %s1588_s14, 1 }
  0x33   : > { %s1738_s19 = scalar_lea.hbm %s2027_s1, %s1324_s8  ;;  %s158_s20 = scalar_lea.vmem [#allocation5], %s1279_s7 }
  0x34   : > { %p1731_p12 = pnand %p2036_p11, %p175_p9  ;;  %s167_s26 = sshll.u32 %s158_s20, 4  ;;  %s1740_s26 = int_to_ptr.vmem [resolvable:$true] %s167_s26 }
  0x35   : > { %s155_s30 = scalar_lea.sflag [#allocation6], %s1677_s25  ;;  %s1472_s4 = scalar_lea.hbm %s1738_s19, 256 }
  0x36   : > { %p1473_p1 = scmp.ne.s32.totalorder %s1738_s19, %s1472_s4  ;;  %s1477_s28 = scalar_lea.hbm %s2027_s1, 512 }
  0x37   : > { %p1478_p2 = scmp.lt.u32.totalorder %s1738_s19, %s2027_s1  ;;  %p1479_p5 = scmp.lt.u32.totalorder %s1477_s28, %s1472_s4 }
  0x38   : > { %p1475_p6 = pnand %p1473_p1, %p1444_p3  ;;  %p1481_p7 = scmp.lt.u32.totalorder %s1472_s4, %s1738_s19 }
  0x39   : > { %p1480_p4 = por %p1479_p5, %p1478_p2 }
  0x3a   : > { %p1476_p13 = pneg %p1475_p6 }
  0x3b   : > { %p1482_p10 = por %p1481_p7, %p1480_p4 }
  0x3d   : > { %p1483_p9 = pnand %p1482_p10, %p1476_p13 }
  0x3f   : > { %1486 = shalt.err (!%p1483_p9)
}
  0x40   : > { %s1487_s7 = scalar_lea.vmem %s1740_s26, 256  ;;  %s1593_s18 = smov [#allocation5]  }
  0x41   : > { %p1488_p11 = scmp.ne.s32.totalorder %s1740_s26, %s1487_s7  ;;  %s1492_s20 = sshll.u32 %s1593_s18, 4  ;;  %s1493_s20 = int_to_ptr.vmem [resolvable:$false] %s1492_s20 }
  0x42   : > { %s1494_s6 = scalar_lea.vmem %s1493_s20, 512  ;;  %p1495_p8 = scmp.lt.s32.totalorder %s1740_s26, %s1493_s20 }
  0x43   : > { %p1490_p1 = pnand %p1488_p11, %p1444_p3  ;;  %p1496_p2 = scmp.lt.s32.totalorder %s1494_s6, %s1487_s7 }
  0x45   : > { %p1491_p6 = pneg %p1490_p1  ;;  %p1497_p5 = por %p1496_p2, %p1495_p8 }
  0x47   : > { %p1498_p4 = pnand %p1497_p5, %p1491_p6 }
  0x49   : > { %1501 = shalt.err (!%p1498_p4)
}
  0x4a   : > { %1383 = dma.hbm_to_vmem [thread:$0]  (!%p1690_p0), %s1738_s19, 256, %s1740_s26, %s155_s30, %s1591_s29, %s1591_s29, %s1592_s3  }
  0x4b   : > { %179 = sbr.rel (%p1731_p12) target bundleno = 373 (0x175), region = 28  ;;  %s1774_s4 = sand.u32 (!%p1731_p12), 1, %s1572_s10  }
  0x4c   : > { %s1283_s27 = sshll.u32 (!%p1731_p12), %s1774_s4, 3  ;;  %s182_s28 = scalar_lea.sflag (!%p1731_p12), [#allocation3], %s1774_s4 }
  0x4d   : > { %s1778_s5 = scalar_lea.vmem (!%p1731_p12), [#allocation2], %s1283_s27  ;;  %p2038_p8 = scmp.ne.s32.totalorder (!%p1731_p12), %s2032_s21, 0 }
  0x52   : > { %1555 = dma.done.wait (%p2038_p8), %s182_s28, 128  }
  0x53   : > { %1557 = vsyncadd (%p2038_p8), %s182_s28, 4294967168  ;;  %s1284_s25 = sshll.u32 %s1774_s4, 4  ;;  %s191_s29 = scalar_lea.sflag [#allocation6], %s1774_s4 }
  0x54   : > { %s194_s3 = scalar_lea.vmem [#allocation5], %s1284_s25 }
  0x55   : > { %1559 = dma.done.wait (%p2038_p8), %s191_s29, 256  }
  0x56   : > { %1561 = vsyncadd (%p2038_p8), %s191_s29, 4294967040  ;;  %v234_v0 = vlaneseq  ;;  %v1363_v4 = vld [vmem:[%s194_s3] sm:$0xff]   ;;  %v1370_v9 = vld [vmem:[%s194_s3 + $0x8] sm:$0xff]   ;;  %vm1018_vm3 = vcmask 1041409   ;;  %vm1020_vm5 = vcmask 1042434   ;;  %vm1022_vm7 = vcmask 1043459  }
  0x57   : > { %v1364_v5 = vunpack.c.l.bf16 %v1363_v4  ;;  %v1792_v12 = vunpack.c.h.bf16 %v1363_v4  ;;  %v1794_v13 = vunpack.c.l.bf16 %v1370_v9  ;;  %v1796_v14 = vunpack.c.h.bf16 %v1370_v9  ;;  %v1359_v48 = vld [vmem:[%s1778_s5] sm:$0xff]   ;;  %s1894_s21 = scalar_lea.vmem [#allocation7], %s1284_s25  ;;  %s1357_s15 = sshll.u32 %s1580_s12, 8 }
  0x58   : > { %v235_v1 = vshrl.u32 %v234_v0, 7  ;;  %v1847_v51 = vunpack.c.l.bf16 %v1359_v48  ;;  %v1849_v52 = vunpack.c.h.bf16 %v1359_v48  ;;  %vm1024_vm8 = vcmask 1044484   ;;  %s1162_s19 = sshll.u32 %s1894_s21, 4  ;;  %s1974_s8 = scalar_lea.hbm %s2028_s2, %s1357_s15  ;;  %s1976_s19 = int_to_ptr.vmem [resolvable:$true] %s1162_s19 }
  0x59   : > { %vm1026_vm9 = vcmask 1045509   ;;  %vm1028_vm11 = vcmask 1046534   ;;  %vm1030_vm12 = vcmask 1047559   ;;  %s1146_s12 = scalar_lea.sflag [#allocation4], %s1774_s4  ;;  %s1502_s16 = scalar_lea.vmem %s1976_s19, 256 }
  0x5a   : > { %v247_v2 = vsub.s32 1, %v235_v1  ;;  %v236_v3 = vsub.s32 0, %v235_v1  ;;  %v258_v8 = vsub.s32 2, %v235_v1  ;;  %v302_v10 = vsub.s32 6, %v235_v1  ;;  %p1503_p0 = scmp.ne.s32.totalorder %s1976_s19, %s1502_s16  ;;  %p2039_p3 = scmp.ne.s32.totalorder %s2033_s22, 0 }
  0x5b   : > { %v313_v11 = vsub.s32 7, %v235_v1  ;;  %v269_v16 = vsub.s32 3, %v235_v1  ;;  %v280_v24 = vsub.s32 4, %v235_v1  ;;  %v1816_v26 = vsub.s32 5, %v235_v1  ;;  %s1594_s7 = smov [#allocation7]  }
  0x5c   : > { %v248_v6 = vrot.slane %v1364_v5, %v247_v2  ;;  %v237_v7 = vrot.slane %v1364_v5, %v236_v3  ;;  %v259_v15 = vrot.slane %v1364_v5, %v258_v8  ;;  %v1799_v17 = vrot.slane %v1792_v12, %v302_v10  ;;  %p1504_p12 = pnand %p1503_p0, %p2039_p3  ;;  %s1506_s18 = sshll.u32 %s1594_s7, 4  ;;  %s1507_s18 = int_to_ptr.vmem [resolvable:$false] %s1506_s18 }
  0x5d   : > { %v1802_v18 = vrot.slane %v1794_v13, %v302_v10  ;;  %v1805_v19 = vrot.slane %v1796_v14, %v302_v10  ;;  %v1808_v20 = vrot.slane %v1792_v12, %v313_v11  ;;  %v1811_v21 = vrot.slane %v1794_v13, %v313_v11  ;;  %s1508_s20 = scalar_lea.vmem %s1507_s18, 512  ;;  %p1509_p7 = scmp.lt.s32.totalorder %s1976_s19, %s1507_s18 }
  0x5e   : > { %250 = vbcast.lane.b32.xlu1 %v248_v6, 256  ;;  %239 = vbcast.lane.b32.xlu0 %v237_v7, 256  ;;  %v1814_v22 = vrot.slane %v1796_v14, %v313_v11  ;;  %v270_v23 = vrot.slane %v1364_v5, %v269_v16  ;;  %v281_v25 = vrot.slane %v1364_v5, %v280_v24  ;;  %p1505_p13 = pneg %p1504_p12  ;;  %p1510_p10 = scmp.lt.s32.totalorder %s1508_s20, %s1502_s16 }
  0x5f   : > { %v292_v27 = vrot.slane %v1364_v5, %v1816_v26  ;;  %v303_v28 = vrot.slane %v1364_v5, %v302_v10  ;;  %v314_v29 = vrot.slane %v1364_v5, %v313_v11  ;;  %v325_v30 = vrot.slane %v1792_v12, %v236_v3 }
  0x60   : > { %v336_v31 = vrot.slane %v1792_v12, %v247_v2  ;;  %v413_v32 = vrot.slane %v1794_v13, %v236_v3  ;;  %v424_v33 = vrot.slane %v1794_v13, %v247_v2  ;;  %v501_v34 = vrot.slane %v1796_v14, %v236_v3  ;;  %p1511_p9 = por %p1510_p10, %p1509_p7 }
  0x61   : > { %v512_v35 = vrot.slane %v1796_v14, %v247_v2  ;;  %v347_v36 = vrot.slane %v1792_v12, %v258_v8  ;;  %v435_v37 = vrot.slane %v1794_v13, %v258_v8  ;;  %v523_v38 = vrot.slane %v1796_v14, %v258_v8 }
  0x62   : > { %254 = vbcast.lane.b32.xlu1 %v248_v6, 264  ;;  %243 = vbcast.lane.b32.xlu0 %v237_v7, 264  ;;  %v358_v39 = vrot.slane %v1792_v12, %v269_v16  ;;  %v446_v40 = vrot.slane %v1794_v13, %v269_v16  ;;  %v534_v41 = vrot.slane %v1796_v14, %v269_v16  ;;  %p1512_p11 = pnand %p1511_p9, %p1505_p13 }
  0x63   : > { %v369_v42 = vrot.slane %v1792_v12, %v280_v24  ;;  %v457_v43 = vrot.slane %v1794_v13, %v280_v24  ;;  %v545_v44 = vrot.slane %v1796_v14, %v280_v24  ;;  %v380_v45 = vrot.slane %v1792_v12, %v1816_v26 }
  0x64   : > { %v468_v46 = vrot.slane %v1794_v13, %v1816_v26  ;;  %v556_v47 = vrot.slane %v1796_v14, %v1816_v26 }
  0x66   : > { %265 = vbcast.lane.b32.xlu1 %v259_v15, 264  ;;  %261 = vbcast.lane.b32.xlu0 %v259_v15, 256 }
  0x6a   : > { %276 = vbcast.lane.b32.xlu1 %v270_v23, 264  ;;  %272 = vbcast.lane.b32.xlu0 %v270_v23, 256 }
  0x6e   : > { %287 = vbcast.lane.b32.xlu1 %v281_v25, 264  ;;  %283 = vbcast.lane.b32.xlu0 %v281_v25, 256 }
  0x72   : > { %298 = vbcast.lane.b32.xlu1 %v292_v27, 264  ;;  %294 = vbcast.lane.b32.xlu0 %v292_v27, 256 }
  0x76   : > { %309 = vbcast.lane.b32.xlu1 %v303_v28, 264  ;;  %305 = vbcast.lane.b32.xlu0 %v303_v28, 256 }
  0x7a   : > { %320 = vbcast.lane.b32.xlu1 %v314_v29, 264  ;;  %316 = vbcast.lane.b32.xlu0 %v314_v29, 256 }
  0x7e   : > { %331 = vbcast.lane.b32.xlu1 %v325_v30, 264  ;;  %327 = vbcast.lane.b32.xlu0 %v325_v30, 256 }
  0x82   : > { %342 = vbcast.lane.b32.xlu1 %v336_v31, 264  ;;  %338 = vbcast.lane.b32.xlu0 %v336_v31, 256 }
  0x86   : > { %419 = vbcast.lane.b32.xlu1 %v413_v32, 264  ;;  %415 = vbcast.lane.b32.xlu0 %v413_v32, 256 }
  0x8a   : > { %430 = vbcast.lane.b32.xlu1 %v424_v33, 264  ;;  %426 = vbcast.lane.b32.xlu0 %v424_v33, 256 }
  0x8e   : > { %507 = vbcast.lane.b32.xlu1 %v501_v34, 264  ;;  %503 = vbcast.lane.b32.xlu0 %v501_v34, 256 }
  0x92   : > { %518 = vbcast.lane.b32.xlu1 %v512_v35, 264  ;;  %514 = vbcast.lane.b32.xlu0 %v512_v35, 256 }
  0x96   : > { %353 = vbcast.lane.b32.xlu1 %v347_v36, 264  ;;  %349 = vbcast.lane.b32.xlu0 %v347_v36, 256 }
  0x9a   : > { %441 = vbcast.lane.b32.xlu1 %v435_v37, 264  ;;  %437 = vbcast.lane.b32.xlu0 %v435_v37, 256 }
  0x9e   : > { %529 = vbcast.lane.b32.xlu1 %v523_v38, 264  ;;  %525 = vbcast.lane.b32.xlu0 %v523_v38, 256 }
  0xa2   : > { %364 = vbcast.lane.b32.xlu1 %v358_v39, 264  ;;  %360 = vbcast.lane.b32.xlu0 %v358_v39, 256 }
  0xa6   : > { %452 = vbcast.lane.b32.xlu1 %v446_v40, 264  ;;  %448 = vbcast.lane.b32.xlu0 %v446_v40, 256 }
  0xaa   : > { %540 = vbcast.lane.b32.xlu1 %v534_v41, 264  ;;  %536 = vbcast.lane.b32.xlu0 %v534_v41, 256 }
  0xae   : > { %375 = vbcast.lane.b32.xlu1 %v369_v42, 264  ;;  %371 = vbcast.lane.b32.xlu0 %v369_v42, 256 }
  0xb2   : > { %463 = vbcast.lane.b32.xlu1 %v457_v43, 264  ;;  %459 = vbcast.lane.b32.xlu0 %v457_v43, 256 }
  0xb6   : > { %551 = vbcast.lane.b32.xlu1 %v545_v44, 264  ;;  %547 = vbcast.lane.b32.xlu0 %v545_v44, 256 }
  0xba   : > { %386 = vbcast.lane.b32.xlu1 %v380_v45, 264  ;;  %382 = vbcast.lane.b32.xlu0 %v380_v45, 256 }
  0xbe   : > { %474 = vbcast.lane.b32.xlu1 %v468_v46, 264  ;;  %470 = vbcast.lane.b32.xlu0 %v468_v46, 256 }
  0xc2   : > { %562 = vbcast.lane.b32.xlu1 %v556_v47, 264  ;;  %558 = vbcast.lane.b32.xlu0 %v556_v47, 256 }
  0xc6   : > { %397 = vbcast.lane.b32.xlu1 %v1799_v17, 264  ;;  %393 = vbcast.lane.b32.xlu0 %v1799_v17, 256 }
  0xca   : > { %485 = vbcast.lane.b32.xlu1 %v1802_v18, 264  ;;  %481 = vbcast.lane.b32.xlu0 %v1802_v18, 256 }
  0xce   : > { %573 = vbcast.lane.b32.xlu1 %v1805_v19, 264  ;;  %569 = vbcast.lane.b32.xlu0 %v1805_v19, 256 }
  0xd0   : > { %v251_v49 = vpop.permute.xlu1 %250  ;;  %v240_v50 = vpop.permute.xlu0 %239 }
  0xd1   : > { %v588_v55 = vadd.f32 %v1847_v51, %v251_v49  ;;  %v586_v56 = vadd.f32 %v1847_v51, %v240_v50 }
  0xd2   : > { %408 = vbcast.lane.b32.xlu1 %v1808_v20, 264  ;;  %404 = vbcast.lane.b32.xlu0 %v1808_v20, 256 }
  0xd4   : > { %v255_v53 = vpop.permute.xlu1 %254  ;;  %v244_v54 = vpop.permute.xlu0 %243 }
  0xd5   : > { %v589_v57 = vadd.f32 %v1849_v52, %v255_v53  ;;  %v587_v58 = vadd.f32 %v1849_v52, %v244_v54 }
  0xd6   : > { %496 = vbcast.lane.b32.xlu1 %v1811_v21, 264  ;;  %492 = vbcast.lane.b32.xlu0 %v1811_v21, 256 }
  0xd7   : > { %v657_v59 = vmax.f32 %v588_v55, %v589_v57  ;;  %v650_v60 = vmax.f32 %v586_v56, %v587_v58 }
  0xd8   : > { %v266_v61 = vpop.permute.xlu1 %265  ;;  %v262_v62 = vpop.permute.xlu0 %261 }
  0xd9   : > { %v658_v63 = vrot.slane %v657_v59, 4  ;;  %v651_v0 = vrot.slane %v650_v60, 4  ;;  %v591_v1 = vadd.f32 %v1849_v52, %v266_v61  ;;  %v590_v2 = vadd.f32 %v1847_v51, %v262_v62 }
  0xda   : > { %584 = vbcast.lane.b32.xlu1 %v1814_v22, 264  ;;  %580 = vbcast.lane.b32.xlu0 %v1814_v22, 256 }
  0xdb   : > { %v659_v3 = vmax.f32 %v657_v59, %v658_v63  ;;  %v652_v4 = vmax.f32 %v650_v60, %v651_v0  ;;  %v664_v5 = vmax.f32 %v590_v2, %v591_v1 }
  0xdc   : > { %v277_v6 = vpop.permute.xlu1 %276  ;;  %v273_v7 = vpop.permute.xlu0 %272 }
  0xdd   : > { %v660_v8 = vrot.slane %v659_v3, 2  ;;  %v653_v9 = vrot.slane %v652_v4, 2  ;;  %v665_v10 = vrot.slane %v664_v5, 4  ;;  %v593_v11 = vadd.f32 %v1849_v52, %v277_v6 }
  0xde   : > { %v592_v12 = vadd.f32 %v1847_v51, %v273_v7 }
  0xdf   : > { %v661_v13 = vmax.f32 %v659_v3, %v660_v8  ;;  %v654_v14 = vmax.f32 %v652_v4, %v653_v9  ;;  %v666_v15 = vmax.f32 %v664_v5, %v665_v10 }
  0xe0   : > { %v671_v16 = vmax.f32 %v592_v12, %v593_v11  ;;  %v288_v17 = vpop.permute.xlu1 %287  ;;  %v284_v18 = vpop.permute.xlu0 %283 }
  0xe1   : > { %v662_v19 = vrot.slane %v661_v13, 1  ;;  %v667_v20 = vrot.slane %v666_v15, 2  ;;  %v595_v21 = vadd.f32 %v1849_v52, %v288_v17  ;;  %v655_v22 = vrot.slane %v654_v14, 1 }
  0xe2   : > { %v672_v23 = vrot.slane %v671_v16, 4  ;;  %v594_v24 = vadd.f32 %v1847_v51, %v284_v18 }
  0xe3   : > { %v668_v25 = vmax.f32 %v666_v15, %v667_v20  ;;  %v663_v30 = vmax.f32 %v661_v13, %v662_v19  ;;  %v656_v33 = vmax.f32 %v654_v14, %v655_v22 }
  0xe4   : > { %v673_v26 = vmax.f32 %v671_v16, %v672_v23  ;;  %v678_v27 = vmax.f32 %v594_v24, %v595_v21  ;;  %v299_v28 = vpop.permute.xlu1 %298  ;;  %v295_v29 = vpop.permute.xlu0 %294 }
  0xe5   : > { %v669_v31 = vrot.slane %v668_v25, 1  ;;  %v597_v32 = vadd.f32 %v1849_v52, %v299_v28  ;;  %v596_v36 = vadd.f32 %v1847_v51, %v295_v29  ;;  %vm875_vm0 = vcmp.eq.f32.partialorder %v663_v30, -inf }
  0xe6   : > { %v674_v34 = vrot.slane %v673_v26, 2  ;;  %v679_v35 = vrot.slane %v678_v27, 4  ;;  %vm874_vm1 = vcmp.eq.f32.partialorder %v656_v33, -inf  ;;  %v907_v48 = vsel %vm875_vm0, 0.0, %v663_v30 }
  0xe7   : > { %v670_v37 = vmax.f32 %v668_v25, %v669_v31  ;;  %v685_v42 = vmax.f32 %v596_v36, %v597_v32  ;;  %v906_v55 = vsel %vm874_vm1, 0.0, %v656_v33  ;;  %v1326_v1 = vpack.c.bf16 %v907_v48, %v907_v48 }
  0xe8   : > { %v675_v38 = vmax.f32 %v673_v26, %v674_v34  ;;  %v680_v39 = vmax.f32 %v678_v27, %v679_v35  ;;  %v310_v40 = vpop.permute.xlu1 %309  ;;  %v306_v41 = vpop.permute.xlu0 %305  ;;  %v1325_v2 = vpack.c.bf16 %v906_v55, %v906_v55 }
  0xe9   : > { %v599_v45 = vadd.f32 %v1849_v52, %v310_v40  ;;  %v686_v46 = vrot.slane %v685_v42, 4  ;;  %v598_v47 = vadd.f32 %v1847_v51, %v306_v41  ;;  %vm876_vm2 = vcmp.eq.f32.partialorder %v670_v37, -inf }
  0xea   : > { %v676_v43 = vrot.slane %v675_v38, 1  ;;  %v681_v44 = vrot.slane %v680_v39, 2  ;;  %v908_v61 = vsel %vm876_vm2, 0.0, %v670_v37  ;;  %v1003_v17 = vunpack.c.l.b16 %v1326_v1 }
  0xeb   : > { %v687_v56 = vmax.f32 %v685_v42, %v686_v46  ;;  %v692_v57 = vmax.f32 %v598_v47, %v599_v45  ;;  %v1327_v11 = vpack.c.bf16 %v908_v61, %v908_v61  ;;  %v1002_v18 = vunpack.c.l.b16 %v1325_v2 }
  0xec   : > { %v677_v49 = vmax.f32 %v675_v38, %v676_v43  ;;  %v682_v50 = vmax.f32 %v680_v39, %v681_v44  ;;  %v321_v53 = vpop.permute.xlu1 %320  ;;  %v317_v54 = vpop.permute.xlu0 %316 }
  0xed   : > { %v601_v58 = vadd.f32 %v1849_v52, %v321_v53  ;;  %v600_v60 = vadd.f32 %v1847_v51, %v317_v54  ;;  %v688_v63 = vrot.slane %v687_v56, 2  ;;  %v693_v0 = vrot.slane %v692_v57, 4 }
  0xee   : > { %vm877_vm4 = vcmp.eq.f32.partialorder %v677_v49, -inf  ;;  %v683_v59 = vrot.slane %v682_v50, 1  ;;  %v1004_v27 = vunpack.c.l.b16 %v1327_v11  ;;  %v1019_v34 = vsel %vm1018_vm3, %v1003_v17, %v1002_v18 }
  0xef   : > { %v909_v62 = vsel %vm877_vm4, 0.0, %v677_v49  ;;  %v699_v4 = vmax.f32 %v600_v60, %v601_v58  ;;  %v689_v7 = vmax.f32 %v687_v56, %v688_v63  ;;  %v694_v8 = vmax.f32 %v692_v57, %v693_v0 }
  0xf0   : > { %v684_v3 = vmax.f32 %v682_v50, %v683_v59  ;;  %v332_v5 = vpop.permute.xlu1 %331  ;;  %v328_v6 = vpop.permute.xlu0 %327  ;;  %v1328_v12 = vpack.c.bf16 %v909_v62, %v909_v62  ;;  %v1021_v44 = vsel %vm1020_vm5, %v1004_v27, %v1019_v34 }
  0xf1   : > { %v603_v9 = vadd.f32 %v1849_v52, %v332_v5  ;;  %v602_v10 = vadd.f32 %v1847_v51, %v328_v6  ;;  %v700_v13 = vrot.slane %v699_v4, 4  ;;  %v690_v14 = vrot.slane %v689_v7, 1 }
  0xf2   : > { %vm878_vm6 = vcmp.eq.f32.partialorder %v684_v3, -inf  ;;  %v695_v15 = vrot.slane %v694_v8, 2  ;;  %v1005_v28 = vunpack.c.l.b16 %v1328_v12 }
  0xf3   : > { %v706_v16 = vmax.f32 %v602_v10, %v603_v9  ;;  %v910_v19 = vsel %vm878_vm6, 0.0, %v684_v3  ;;  %v701_v20 = vmax.f32 %v699_v4, %v700_v13  ;;  %v691_v23 = vmax.f32 %v689_v7, %v690_v14 }
  0xf4   : > { %v343_v21 = vpop.permute.xlu1 %342  ;;  %v339_v22 = vpop.permute.xlu0 %338  ;;  %v696_v24 = vmax.f32 %v694_v8, %v695_v15  ;;  %v1329_v31 = vpack.c.bf16 %v910_v19, %v910_v19  ;;  %v1023_v48 = vsel %vm1022_vm7, %v1005_v28, %v1021_v44 }
  0xf5   : > { %v707_v25 = vrot.slane %v706_v16, 4  ;;  %v605_v26 = vadd.f32 %v1849_v52, %v343_v21  ;;  %v702_v29 = vrot.slane %v701_v20, 2  ;;  %v604_v30 = vadd.f32 %v1847_v51, %v339_v22 }
  0xf6   : > { %vm879_vm10 = vcmp.eq.f32.partialorder %v691_v23, -inf  ;;  %v697_v32 = vrot.slane %v696_v24, 1  ;;  %v1006_v49 = vunpack.c.l.b16 %v1329_v31 }
  0xf7   : > { %v708_v33 = vmax.f32 %v706_v16, %v707_v25  ;;  %v911_v35 = vsel %vm879_vm10, 0.0, %v691_v23  ;;  %v703_v36 = vmax.f32 %v701_v20, %v702_v29  ;;  %v713_v37 = vmax.f32 %v604_v30, %v605_v26 }
  0xf8   : > { %v420_v38 = vpop.permute.xlu1 %419  ;;  %v416_v39 = vpop.permute.xlu0 %415  ;;  %v1330_v40 = vpack.c.bf16 %v911_v35, %v911_v35  ;;  %v698_v41 = vmax.f32 %v696_v24, %v697_v32  ;;  %v1025_v2 = vsel %vm1024_vm8, %v1006_v49, %v1023_v48 }
  0xf9   : > { %v709_v42 = vrot.slane %v708_v33, 2  ;;  %v619_v43 = vadd.f32 %v1849_v52, %v420_v38  ;;  %v704_v45 = vrot.slane %v703_v36, 1  ;;  %v714_v46 = vrot.slane %v713_v37, 4 }
  0xfa   : > { %v618_v47 = vadd.f32 %v1847_v51, %v416_v39  ;;  %vm880_vm13 = vcmp.eq.f32.partialorder %v698_v41, -inf  ;;  %v1007_v59 = vunpack.c.l.b16 %v1330_v40 }
  0xfb   : > { %v710_v50 = vmax.f32 %v708_v33, %v709_v42  ;;  %v912_v53 = vsel %vm880_vm13, 0.0, %v698_v41  ;;  %v705_v54 = vmax.f32 %v703_v36, %v704_v45  ;;  %v715_v55 = vmax.f32 %v713_v37, %v714_v46 }
  0xfc   : > { %v762_v56 = vmax.f32 %v618_v47, %v619_v43  ;;  %v431_v57 = vpop.permute.xlu1 %430  ;;  %v427_v58 = vpop.permute.xlu0 %426  ;;  %v1331_v60 = vpack.c.bf16 %v912_v53, %v912_v53  ;;  %v1027_v12 = vsel %vm1026_vm9, %v1007_v59, %v1025_v2 }
  0xfd   : > { %v711_v61 = vrot.slane %v710_v50, 1  ;;  %v621_v62 = vadd.f32 %v1849_v52, %v431_v57  ;;  %vm881_vm14 = vcmp.eq.f32.partialorder %v705_v54, -inf  ;;  %v716_v63 = vrot.slane %v715_v55, 2 }
  0xfe   : > { %v763_v0 = vrot.slane %v762_v56, 4  ;;  %v620_v1 = vadd.f32 %v1847_v51, %v427_v58  ;;  %v1008_v3 = vunpack.c.l.b16 %v1331_v60  ;;  %v913_v4 = vsel %vm881_vm14, 0.0, %v705_v54 }
  0xff   : > { %v712_v5 = vmax.f32 %v710_v50, %v711_v61  ;;  %v1332_v6 = vpack.c.bf16 %v913_v4, %v913_v4  ;;  %v717_v7 = vmax.f32 %v715_v55, %v716_v63 }
 0x100   : > { %v764_v8 = vmax.f32 %v762_v56, %v763_v0  ;;  %v769_v9 = vmax.f32 %v620_v1, %v621_v62  ;;  %v508_v10 = vpop.permute.xlu1 %507  ;;  %v504_v11 = vpop.permute.xlu0 %503  ;;  %v1029_v19 = vsel %vm1028_vm11, %v1008_v3, %v1027_v12 }
 0x101   : > { %vm882_vm15 = vcmp.eq.f32.partialorder %v712_v5, -inf  ;;  %v635_v13 = vadd.f32 %v1849_v52, %v508_v10  ;;  %v634_v14 = vadd.f32 %v1847_v51, %v504_v11  ;;  %v1009_v15 = vunpack.c.l.b16 %v1332_v6 }
 0x102   : > { %v914_v16 = vsel %vm882_vm15, 0.0, %v712_v5  ;;  %v718_v17 = vrot.slane %v717_v7, 1  ;;  %v765_v18 = vrot.slane %v764_v8, 2  ;;  %v770_v20 = vrot.slane %v769_v9, 4 }
 0x103   : > { %v818_v21 = vmax.f32 %v634_v14, %v635_v13  ;;  %v1031_v22 = vsel %vm1030_vm12, %v1009_v15, %v1029_v19  ;;  %v1333_v28 = vpack.c.bf16 %v914_v16, %v914_v16 }
 0x104   : > { %v719_v23 = vmax.f32 %v717_v7, %v718_v17  ;;  %v766_v24 = vmax.f32 %v764_v8, %v765_v18  ;;  %v519_v25 = vpop.permute.xlu1 %518  ;;  %v515_v26 = vpop.permute.xlu0 %514  ;;  %v1039_v27 = vpack.c.b16 %v1031_v22, %v1031_v22  ;;  %v771_v29 = vmax.f32 %v769_v9, %v770_v20 }
 0x105   : > { %v819_v30 = vrot.slane %v818_v21, 4  ;;  %v637_v32 = vadd.f32 %v1849_v52, %v519_v25  ;;  %v636_v33 = vadd.f32 %v1847_v51, %v515_v26  ;;  %v1010_v46 = vunpack.c.l.b16 %v1333_v28 }
 0x106   : > { %vm883_vm0 = vcmp.eq.f32.partialorder %v719_v23, -inf  ;;  %v767_v31 = vrot.slane %v766_v24, 1  ;;  %1043 = vst [vmem:[%s1894_s21] sm:$0xf] %v1039_v27  ;;  %v772_v35 = vrot.slane %v771_v29, 2 }
 0x107   : > { %v915_v34 = vsel %vm883_vm0, 0.0, %v719_v23  ;;  %v820_v36 = vmax.f32 %v818_v21, %v819_v30  ;;  %v825_v39 = vmax.f32 %v636_v33, %v637_v32 }
 0x108   : > { %v1334_v37 = vpack.c.bf16 %v915_v34, %v915_v34  ;;  %v768_v38 = vmax.f32 %v766_v24, %v767_v31  ;;  %v354_v40 = vpop.permute.xlu1 %353  ;;  %v350_v41 = vpop.permute.xlu0 %349  ;;  %v773_v42 = vmax.f32 %v771_v29, %v772_v35 }
 0x109   : > { %v821_v43 = vrot.slane %v820_v36, 2  ;;  %v607_v44 = vadd.f32 %v1849_v52, %v354_v40  ;;  %v606_v45 = vadd.f32 %v1847_v51, %v350_v41  ;;  %v826_v48 = vrot.slane %v825_v39, 4 }
 0x10a   : > { %v1011_v47 = vunpack.c.l.b16 %v1334_v37  ;;  %vm890_vm1 = vcmp.eq.f32.partialorder %v768_v38, -inf  ;;  %v774_v49 = vrot.slane %v773_v42, 1 }
 0x10b   : > { %v822_v50 = vmax.f32 %v820_v36, %v821_v43  ;;  %v720_v53 = vmax.f32 %v606_v45, %v607_v44  ;;  %v922_v55 = vsel %vm890_vm1, 0.0, %v768_v38  ;;  %v827_v56 = vmax.f32 %v825_v39, %v826_v48 }
 0x10c   : > { %v1900_v54 = vsel %vm1018_vm3, %v1011_v47, %v1010_v46  ;;  %v442_v57 = vpop.permute.xlu1 %441  ;;  %v438_v58 = vpop.permute.xlu0 %437  ;;  %v775_v59 = vmax.f32 %v773_v42, %v774_v49  ;;  %v1341_v1 = vpack.c.bf16 %v922_v55, %v922_v55 }
 0x10d   : > { %v823_v60 = vrot.slane %v822_v50, 1  ;;  %v721_v61 = vrot.slane %v720_v53, 4  ;;  %v623_v62 = vadd.f32 %v1849_v52, %v442_v57  ;;  %v828_v63 = vrot.slane %v827_v56, 2 }
 0x10e   : > { %v622_v0 = vadd.f32 %v1847_v51, %v438_v58  ;;  %vm891_vm2 = vcmp.eq.f32.partialorder %v775_v59, -inf  ;;  %v1109_v16 = vunpack.c.l.b16 %v1341_v1 }
 0x10f   : > { %v824_v2 = vmax.f32 %v822_v50, %v823_v60  ;;  %v722_v3 = vmax.f32 %v720_v53, %v721_v61  ;;  %v923_v4 = vsel %vm891_vm2, 0.0, %v775_v59  ;;  %v829_v5 = vmax.f32 %v827_v56, %v828_v63 }
 0x110   : > { %v776_v6 = vmax.f32 %v622_v0, %v623_v62  ;;  %v530_v7 = vpop.permute.xlu1 %529  ;;  %v526_v8 = vpop.permute.xlu0 %525  ;;  %v1342_v9 = vpack.c.bf16 %v923_v4, %v923_v4 }
 0x111   : > { %vm898_vm4 = vcmp.eq.f32.partialorder %v824_v2, -inf  ;;  %v723_v10 = vrot.slane %v722_v3, 2  ;;  %v639_v11 = vadd.f32 %v1849_v52, %v530_v7  ;;  %v830_v13 = vrot.slane %v829_v5, 1 }
 0x112   : > { %v930_v12 = vsel %vm898_vm4, 0.0, %v824_v2  ;;  %v777_v14 = vrot.slane %v776_v6, 4  ;;  %v638_v15 = vadd.f32 %v1847_v51, %v526_v8  ;;  %v1110_v17 = vunpack.c.l.b16 %v1342_v9 }
 0x113   : > { %v724_v18 = vmax.f32 %v722_v3, %v723_v10  ;;  %v831_v19 = vmax.f32 %v829_v5, %v830_v13  ;;  %v1349_v25 = vpack.c.bf16 %v930_v12, %v930_v12 }
 0x114   : > { %v778_v20 = vmax.f32 %v776_v6, %v777_v14  ;;  %v832_v21 = vmax.f32 %v638_v15, %v639_v11  ;;  %v365_v22 = vpop.permute.xlu1 %364  ;;  %v361_v23 = vpop.permute.xlu0 %360  ;;  %v1125_v24 = vsel %vm1018_vm3, %v1110_v17, %v1109_v16 }
 0x115   : > { %v725_v26 = vrot.slane %v724_v18, 1  ;;  %v609_v27 = vadd.f32 %v1849_v52, %v365_v22  ;;  %vm899_vm6 = vcmp.eq.f32.partialorder %v831_v19, -inf  ;;  %v608_v30 = vadd.f32 %v1847_v51, %v361_v23 }
 0x116   : > { %v779_v28 = vrot.slane %v778_v20, 2  ;;  %v833_v29 = vrot.slane %v832_v21, 4  ;;  %v931_v31 = vsel %vm899_vm6, 0.0, %v831_v19  ;;  %v1117_v39 = vunpack.c.l.b16 %v1349_v25 }
 0x117   : > { %v726_v32 = vmax.f32 %v724_v18, %v725_v26  ;;  %v1350_v33 = vpack.c.bf16 %v931_v31, %v931_v31  ;;  %v727_v36 = vmax.f32 %v608_v30, %v609_v27 }
 0x118   : > { %v780_v34 = vmax.f32 %v778_v20, %v779_v28  ;;  %v834_v35 = vmax.f32 %v832_v21, %v833_v29  ;;  %v453_v37 = vpop.permute.xlu1 %452  ;;  %v449_v38 = vpop.permute.xlu0 %448 }
 0x119   : > { %vm884_vm10 = vcmp.eq.f32.partialorder %v726_v32, -inf  ;;  %v625_v40 = vadd.f32 %v1849_v52, %v453_v37  ;;  %v624_v41 = vadd.f32 %v1847_v51, %v449_v38  ;;  %v1118_v42 = vunpack.c.l.b16 %v1350_v33 }
 0x11a   : > { %v916_v43 = vsel %vm884_vm10, 0.0, %v726_v32  ;;  %v781_v44 = vrot.slane %v780_v34, 1  ;;  %v835_v45 = vrot.slane %v834_v35, 2  ;;  %v728_v47 = vrot.slane %v727_v36, 4 }
 0x11b   : > { %v1335_v46 = vpack.c.bf16 %v916_v43, %v916_v43  ;;  %v783_v48 = vmax.f32 %v624_v41, %v625_v40  ;;  %v1132_v49 = vsel %vm1018_vm3, %v1118_v42, %v1117_v39 }
 0x11c   : > { %v782_v50 = vmax.f32 %v780_v34, %v781_v44  ;;  %v836_v53 = vmax.f32 %v834_v35, %v835_v45  ;;  %v541_v55 = vpop.permute.xlu1 %540  ;;  %v537_v56 = vpop.permute.xlu0 %536  ;;  %v729_v58 = vmax.f32 %v727_v36, %v728_v47 }
 0x11d   : > { %v1012_v57 = vunpack.c.l.b16 %v1335_v46  ;;  %v784_v59 = vrot.slane %v783_v48, 4  ;;  %v641_v60 = vadd.f32 %v1849_v52, %v541_v55  ;;  %v640_v62 = vadd.f32 %v1847_v51, %v537_v56 }
 0x11e   : > { %vm892_vm13 = vcmp.eq.f32.partialorder %v782_v50, -inf  ;;  %v837_v61 = vrot.slane %v836_v53, 1  ;;  %v730_v1 = vrot.slane %v729_v58, 2 }
 0x11f   : > { %v1033_v63 = vsel %vm1020_vm5, %v1012_v57, %v1900_v54  ;;  %v924_v0 = vsel %vm892_vm13, 0.0, %v782_v50  ;;  %v785_v2 = vmax.f32 %v783_v48, %v784_v59  ;;  %v839_v5 = vmax.f32 %v640_v62, %v641_v60 }
 0x120   : > { %v1343_v3 = vpack.c.bf16 %v924_v0, %v924_v0  ;;  %v838_v4 = vmax.f32 %v836_v53, %v837_v61  ;;  %v376_v6 = vpop.permute.xlu1 %375  ;;  %v372_v7 = vpop.permute.xlu0 %371  ;;  %v731_v8 = vmax.f32 %v729_v58, %v730_v1 }
 0x121   : > { %v786_v9 = vrot.slane %v785_v2, 2  ;;  %v611_v10 = vadd.f32 %v1849_v52, %v376_v6  ;;  %v610_v11 = vadd.f32 %v1847_v51, %v372_v7  ;;  %v840_v13 = vrot.slane %v839_v5, 4 }
 0x122   : > { %v1111_v12 = vunpack.c.l.b16 %v1343_v3  ;;  %vm900_vm3 = vcmp.eq.f32.partialorder %v838_v4, -inf  ;;  %v732_v15 = vrot.slane %v731_v8, 1 }
 0x123   : > { %v932_v14 = vsel %vm900_vm3, 0.0, %v838_v4  ;;  %v787_v54 = vmax.f32 %v785_v2, %v786_v9  ;;  %v841_v18 = vmax.f32 %v839_v5, %v840_v13  ;;  %v734_v19 = vmax.f32 %v610_v11, %v611_v10 }
 0x124   : > { %v1126_v16 = vsel %vm1020_vm5, %v1111_v12, %v1125_v24  ;;  %v1351_v17 = vpack.c.bf16 %v932_v14, %v932_v14  ;;  %v464_v20 = vpop.permute.xlu1 %463  ;;  %v460_v21 = vpop.permute.xlu0 %459  ;;  %v733_v22 = vmax.f32 %v731_v8, %v732_v15 }
 0x125   : > { %v788_v23 = vrot.slane %v787_v54, 1  ;;  %v842_v26 = vrot.slane %v841_v18, 2  ;;  %v735_v31 = vrot.slane %v734_v19, 4  ;;  %v627_v38 = vadd.f32 %v1849_v52, %v464_v20 }
 0x126   : > { %v1119_v25 = vunpack.c.l.b16 %v1351_v17  ;;  %vm885_vm14 = vcmp.eq.f32.partialorder %v733_v22, -inf  ;;  %v626_v39 = vadd.f32 %v1847_v51, %v460_v21 }
 0x127   : > { %v789_v27 = vmax.f32 %v787_v54, %v788_v23  ;;  %v917_v29 = vsel %vm885_vm14, 0.0, %v733_v22  ;;  %v843_v30 = vmax.f32 %v841_v18, %v842_v26  ;;  %v736_v41 = vmax.f32 %v734_v19, %v735_v31 }
 0x128   : > { %v1133_v28 = vsel %vm1020_vm5, %v1119_v25, %v1132_v49  ;;  %v552_v32 = vpop.permute.xlu1 %551  ;;  %v548_v33 = vpop.permute.xlu0 %547  ;;  %v1336_v34 = vpack.c.bf16 %v917_v29, %v917_v29  ;;  %v790_v50 = vmax.f32 %v626_v39, %v627_v38 }
 0x129   : > { %vm893_vm15 = vcmp.eq.f32.partialorder %v789_v27, -inf  ;;  %v844_v35 = vrot.slane %v843_v30, 1  ;;  %v737_v55 = vrot.slane %v736_v41, 2  ;;  %v643_v56 = vadd.f32 %v1849_v52, %v552_v32 }
 0x12a   : > { %v925_v24 = vsel %vm893_vm15, 0.0, %v789_v27  ;;  %v1013_v36 = vunpack.c.l.b16 %v1336_v34  ;;  %v642_v59 = vadd.f32 %v1847_v51, %v548_v33  ;;  %v791_v0 = vrot.slane %v790_v50, 4 }
 0x12b   : > { %v1344_v37 = vpack.c.bf16 %v925_v24, %v925_v24  ;;  %v845_v40 = vmax.f32 %v843_v30, %v844_v35  ;;  %v738_v3 = vmax.f32 %v736_v41, %v737_v55 }
 0x12c   : > { %v387_v42 = vpop.permute.xlu1 %386  ;;  %v383_v43 = vpop.permute.xlu0 %382  ;;  %v1923_v44 = vsel %vm1022_vm7, %v1013_v36, %v1033_v63  ;;  %v846_v6 = vmax.f32 %v642_v59, %v643_v56  ;;  %v792_v10 = vmax.f32 %v790_v50, %v791_v0 }
 0x12d   : > { %v1112_v45 = vunpack.c.l.b16 %v1344_v37  ;;  %v613_v46 = vadd.f32 %v1849_v52, %v387_v42  ;;  %vm901_vm5 = vcmp.eq.f32.partialorder %v845_v40, -inf  ;;  %v612_v47 = vadd.f32 %v1847_v51, %v383_v43 }
 0x12e   : > { %v933_v49 = vsel %vm901_vm5, 0.0, %v845_v40  ;;  %v739_v12 = vrot.slane %v738_v3, 1  ;;  %v847_v54 = vrot.slane %v846_v6, 4  ;;  %v793_v19 = vrot.slane %v792_v10, 2 }
 0x12f   : > { %v1928_v48 = vsel %vm1022_vm7, %v1112_v45, %v1126_v16  ;;  %v1352_v53 = vpack.c.bf16 %v933_v49, %v933_v49  ;;  %v741_v60 = vmax.f32 %v612_v47, %v613_v46 }
 0x130   : > { %v475_v57 = vpop.permute.xlu1 %474  ;;  %v471_v58 = vpop.permute.xlu0 %470  ;;  %v740_v22 = vmax.f32 %v738_v3, %v739_v12  ;;  %v848_v27 = vmax.f32 %v846_v6, %v847_v54  ;;  %v794_v32 = vmax.f32 %v792_v10, %v793_v19 }
 0x131   : > { %v629_v61 = vadd.f32 %v1849_v52, %v475_v57  ;;  %v628_v62 = vadd.f32 %v1847_v51, %v471_v58  ;;  %v1120_v63 = vunpack.c.l.b16 %v1352_v53  ;;  %v742_v7 = vrot.slane %v741_v60, 4 }
 0x132   : > { %v849_v38 = vrot.slane %v848_v27, 2  ;;  %v795_v45 = vrot.slane %v794_v32, 1 }
 0x133   : > { %v797_v1 = vmax.f32 %v628_v62, %v629_v61  ;;  %v1935_v2 = vsel %vm1022_vm7, %v1120_v63, %v1133_v28  ;;  %v743_v16 = vmax.f32 %v741_v60, %v742_v7  ;;  %vm886_vm7 = vcmp.eq.f32.partialorder %v740_v22, -inf }
 0x134   : > { %v563_v4 = vpop.permute.xlu1 %562  ;;  %v559_v5 = vpop.permute.xlu0 %558  ;;  %v918_v49 = vsel %vm886_vm7, 0.0, %v740_v22  ;;  %v850_v58 = vmax.f32 %v848_v27, %v849_v38  ;;  %v796_v3 = vmax.f32 %v794_v32, %v795_v45 }
 0x135   : > { %v645_v8 = vadd.f32 %v1849_v52, %v563_v4  ;;  %v644_v9 = vadd.f32 %v1847_v51, %v559_v5  ;;  %v798_v11 = vrot.slane %v797_v1, 4  ;;  %v744_v28 = vrot.slane %v743_v16, 2 }
 0x136   : > { %vm894_vm0 = vcmp.eq.f32.partialorder %v796_v3, -inf }
 0x137   : > { %v853_v13 = vmax.f32 %v644_v9, %v645_v8  ;;  %v799_v20 = vmax.f32 %v797_v1, %v798_v11  ;;  %v745_v39 = vmax.f32 %v743_v16, %v744_v28  ;;  %v1337_v1 = vpack.c.bf16 %v918_v49, %v918_v49 }
 0x138   : > { %v398_v14 = vpop.permute.xlu1 %397  ;;  %v394_v15 = vpop.permute.xlu0 %393 }
 0x139   : > { %v615_v17 = vadd.f32 %v1849_v52, %v398_v14  ;;  %v614_v18 = vadd.f32 %v1847_v51, %v394_v15  ;;  %v854_v23 = vrot.slane %v853_v13, 4  ;;  %v800_v33 = vrot.slane %v799_v20, 2 }
 0x13a   : > { %v746_v59 = vrot.slane %v745_v39, 1  ;;  %v851_v14 = vrot.slane %v850_v58, 1 }
 0x13b   : > { %v748_v21 = vmax.f32 %v614_v18, %v615_v17  ;;  %v855_v24 = vmax.f32 %v853_v13, %v854_v23  ;;  %v801_v46 = vmax.f32 %v799_v20, %v800_v33  ;;  %v1014_v17 = vunpack.c.l.b16 %v1337_v1 }
 0x13c   : > { %v486_v25 = vpop.permute.xlu1 %485  ;;  %v482_v26 = vpop.permute.xlu0 %481  ;;  %v747_v11 = vmax.f32 %v745_v39, %v746_v59  ;;  %v926_v33 = vsel %vm894_vm0, 0.0, %v796_v3 }
 0x13d   : > { %v749_v29 = vrot.slane %v748_v21, 4  ;;  %v631_v30 = vadd.f32 %v1849_v52, %v486_v25  ;;  %v630_v31 = vadd.f32 %v1847_v51, %v482_v26  ;;  %v856_v50 = vrot.slane %v855_v24, 2 }
 0x13e   : > { %v802_v4 = vrot.slane %v801_v46, 1  ;;  %vm887_vm1 = vcmp.eq.f32.partialorder %v747_v11, -inf  ;;  %v1035_v49 = vsel %vm1024_vm8, %v1014_v17, %v1923_v44 }
 0x13f   : > { %v750_v34 = vmax.f32 %v748_v21, %v749_v29  ;;  %v804_v35 = vmax.f32 %v630_v31, %v631_v30  ;;  %v857_v5 = vmax.f32 %v855_v24, %v856_v50  ;;  %v852_v30 = vmax.f32 %v850_v58, %v851_v14 }
 0x140   : > { %v574_v36 = vpop.permute.xlu1 %573  ;;  %v570_v37 = vpop.permute.xlu0 %569  ;;  %v803_v18 = vmax.f32 %v801_v46, %v802_v4 }
 0x141   : > { %v751_v40 = vrot.slane %v750_v34, 2  ;;  %v647_v41 = vadd.f32 %v1849_v52, %v574_v36  ;;  %v805_v42 = vrot.slane %v804_v35, 4  ;;  %v646_v43 = vadd.f32 %v1847_v51, %v570_v37 }
 0x142   : > { %v858_v21 = vrot.slane %v857_v5, 1  ;;  %vm895_vm4 = vcmp.eq.f32.partialorder %v803_v18, -inf  ;;  %vm902_vm10 = vcmp.eq.f32.partialorder %v852_v30, -inf }
 0x143   : > { %v752_v47 = vmax.f32 %v750_v34, %v751_v40  ;;  %v806_v53 = vmax.f32 %v804_v35, %v805_v42  ;;  %v860_v55 = vmax.f32 %v646_v43, %v647_v41  ;;  %v919_v35 = vsel %vm887_vm1, 0.0, %v747_v11 }
 0x144   : > { %v409_v56 = vpop.permute.xlu1 %408  ;;  %v405_v57 = vpop.permute.xlu0 %404  ;;  %v859_v36 = vmax.f32 %v857_v5, %v858_v21  ;;  %v1345_v42 = vpack.c.bf16 %v926_v33, %v926_v33  ;;  %v1338_v45 = vpack.c.bf16 %v919_v35, %v919_v35  ;;  %v934_v59 = vsel %vm902_vm10, 0.0, %v852_v30 }
 0x145   : > { %v617_v60 = vadd.f32 %v1849_v52, %v409_v56  ;;  %v753_v61 = vrot.slane %v752_v47, 1  ;;  %v807_v62 = vrot.slane %v806_v53, 2  ;;  %v861_v63 = vrot.slane %v860_v55, 4 }
 0x146   : > { %v616_v0 = vadd.f32 %v1847_v51, %v405_v57  ;;  %vm903_vm13 = vcmp.eq.f32.partialorder %v859_v36, -inf  ;;  %v1113_v58 = vunpack.c.l.b16 %v1345_v42  ;;  %v1353_v5 = vpack.c.bf16 %v934_v59, %v934_v59 }
 0x147   : > { %v808_v6 = vmax.f32 %v806_v53, %v807_v62  ;;  %v862_v7 = vmax.f32 %v860_v55, %v861_v63  ;;  %v754_v15 = vmax.f32 %v752_v47, %v753_v61  ;;  %v1015_v62 = vunpack.c.l.b16 %v1338_v45 }
 0x148   : > { %v755_v8 = vmax.f32 %v616_v0, %v617_v60  ;;  %v497_v9 = vpop.permute.xlu1 %496  ;;  %v493_v10 = vpop.permute.xlu0 %492  ;;  %v935_v63 = vsel %vm903_vm13, 0.0, %v859_v36 }
 0x149   : > { %v633_v12 = vadd.f32 %v1849_v52, %v497_v9  ;;  %v632_v13 = vadd.f32 %v1847_v51, %v493_v10  ;;  %v809_v54 = vrot.slane %v808_v6, 1  ;;  %v863_v16 = vrot.slane %v862_v7, 2 }
 0x14a   : > { %v756_v19 = vrot.slane %v755_v8, 4  ;;  %vm888_vm2 = vcmp.eq.f32.partialorder %v754_v15, -inf }
 0x14b   : > { %v811_v20 = vmax.f32 %v632_v13, %v633_v12  ;;  %v810_v22 = vmax.f32 %v808_v6, %v809_v54  ;;  %v864_v23 = vmax.f32 %v862_v7, %v863_v16  ;;  %v920_v38 = vsel %vm888_vm2, 0.0, %v754_v15 }
 0x14c   : > { %v585_v25 = vpop.permute.xlu1 %584  ;;  %v581_v26 = vpop.permute.xlu0 %580  ;;  %v757_v27 = vmax.f32 %v755_v8, %v756_v19  ;;  %v1339_v50 = vpack.c.bf16 %v920_v38, %v920_v38  ;;  %v1354_v8 = vpack.c.bf16 %v935_v63, %v935_v63  ;;  %v1036_v12 = vsel %vm1026_vm9, %v1015_v62, %v1035_v49 }
 0x14d   : > { %v812_v28 = vrot.slane %v811_v20, 4  ;;  %v649_v29 = vadd.f32 %v1849_v52, %v585_v25  ;;  %v865_v31 = vrot.slane %v864_v23, 1  ;;  %v648_v32 = vadd.f32 %v1847_v51, %v581_v26 }
 0x14e   : > { %v758_v34 = vrot.slane %v757_v27, 2  ;;  %vm896_vm6 = vcmp.eq.f32.partialorder %v810_v22, -inf  ;;  %v927_v52 = vsel %vm895_vm4, 0.0, %v803_v18  ;;  %v1016_v1 = vunpack.c.l.b16 %v1339_v50 }
 0x14f   : > { %v813_v24 = vmax.f32 %v811_v20, %v812_v28  ;;  %v867_v37 = vmax.f32 %v648_v32, %v649_v29  ;;  %v866_v39 = vmax.f32 %v864_v23, %v865_v31  ;;  %v928_v46 = vsel %vm896_vm6, 0.0, %v810_v22 }
 0x150   : > { %v759_v40 = vmax.f32 %v757_v27, %v758_v34  ;;  %v1346_v55 = vpack.c.bf16 %v927_v52, %v927_v52  ;;  %v1347_v60 = vpack.c.bf16 %v928_v46, %v928_v46  ;;  %v1128_v54 = vsel %vm1024_vm8, %v1113_v58, %v1928_v48 }
 0x151   : > { %v814_v41 = vrot.slane %v813_v24, 2  ;;  %v868_v43 = vrot.slane %v867_v37, 4  ;;  %vm904_vm3 = vcmp.eq.f32.partialorder %v866_v39, -inf  ;;  %v1037_v16 = vsel %vm1028_vm11, %v1016_v1, %v1036_v12 }
 0x152   : > { %v760_v47 = vrot.slane %v759_v40, 1  ;;  %v936_v3 = vsel %vm904_vm3, 0.0, %v866_v39  ;;  %v1114_v6 = vunpack.c.l.b16 %v1346_v55  ;;  %v1115_v9 = vunpack.c.l.b16 %v1347_v60 }
 0x153   : > { %v815_v51 = vmax.f32 %v813_v24, %v814_v41  ;;  %v869_v53 = vmax.f32 %v867_v37, %v868_v43  ;;  %v1355_v13 = vpack.c.bf16 %v936_v3, %v936_v3  ;;  %v1121_v18 = vunpack.c.l.b16 %v1353_v5 }
 0x154   : > { %v761_v56 = vmax.f32 %v759_v40, %v760_v47  ;;  %v1129_v19 = vsel %vm1026_vm9, %v1114_v6, %v1128_v54  ;;  %v1122_v22 = vunpack.c.l.b16 %v1354_v8 }
 0x155   : > { %v816_v57 = vrot.slane %v815_v51, 1  ;;  %v870_v61 = vrot.slane %v869_v53, 2  ;;  %v1130_v23 = vsel %vm1028_vm11, %v1115_v9, %v1129_v19  ;;  %v1123_v26 = vunpack.c.l.b16 %v1355_v13 }
 0x156   : > { %vm889_vm14 = vcmp.eq.f32.partialorder %v761_v56, -inf  ;;  %v1135_v30 = vsel %vm1024_vm8, %v1121_v18, %v1935_v2 }
 0x157   : > { %v817_v0 = vmax.f32 %v815_v51, %v816_v57  ;;  %v921_v4 = vsel %vm889_vm14, 0.0, %v761_v56  ;;  %v871_v44 = vmax.f32 %v869_v53, %v870_v61  ;;  %v1136_v31 = vsel %vm1026_vm9, %v1122_v22, %v1135_v30 }
 0x158   : > { %v1340_v7 = vpack.c.bf16 %v921_v4, %v921_v4  ;;  %v1137_v33 = vsel %vm1028_vm11, %v1123_v26, %v1136_v31 }
 0x159   : > { %vm897_vm15 = vcmp.eq.f32.partialorder %v817_v0, -inf  ;;  %v872_v11 = vrot.slane %v871_v44, 1 }
 0x15a   : > { %v929_v10 = vsel %vm897_vm15, 0.0, %v817_v0  ;;  %v1017_v14 = vunpack.c.l.b16 %v1340_v7 }
 0x15b   : > { %v1348_v15 = vpack.c.bf16 %v929_v10, %v929_v10  ;;  %v873_v17 = vmax.f32 %v871_v44, %v872_v11 }
 0x15c   : > { %v1038_v20 = vsel %vm1030_vm12, %v1017_v14, %v1037_v16 }
 0x15d   : > { %v1116_v21 = vunpack.c.l.b16 %v1348_v15  ;;  %v1040_v25 = vpack.c.b16 %v1038_v20, %v1038_v20  ;;  %vm905_vm5 = vcmp.eq.f32.partialorder %v873_v17, -inf }
 0x15e   : > { %v937_v27 = vsel %vm905_vm5, 0.0, %v873_v17 }
 0x15f   : > { %v1131_v48 = vsel %vm1030_vm12, %v1116_v21, %v1130_v23  ;;  %1044 = vst [vmem:[%s1894_s21 + $0x8] sm:$0xf] %v1040_v25  ;;  %v1356_v29 = vpack.c.bf16 %v937_v27, %v937_v27 }
 0x160   : > { %v1139_v28 = vpack.c.b16 %v1131_v48, %v1131_v48 }
 0x161   : > { %v1124_v32 = vunpack.c.l.b16 %v1356_v29 }
 0x162   : > { %1143 = vst [vmem:[%s1894_s21 + $0x4] sm:$0xf] %v1139_v28 }
 0x163   : > { %v1138_v34 = vsel %vm1030_vm12, %v1124_v32, %v1137_v33 }
 0x164   : > { %v1140_v2 = vpack.c.b16 %v1138_v34, %v1138_v34 }
 0x166   : > { %1144 = vst [vmem:[%s1894_s21 + $0xc] sm:$0xf] %v1140_v2 }
 0x167   : > { %1515 = shalt.err (!%p1512_p11)
}
 0x168   : > { %s1516_s6 = scalar_lea.hbm %s1974_s8, 256  ;;  %s1520_s5 = scalar_lea.hbm %s2028_s2, 512 }
 0x169   : > { %p1517_p1 = scmp.ne.s32.totalorder %s1974_s8, %s1516_s6  ;;  %p1521_p5 = scmp.lt.u32.totalorder %s1974_s8, %s2028_s2 }
 0x16a   : > { %p1522_p4 = scmp.lt.u32.totalorder %s1520_s5, %s1516_s6  ;;  %p1524_p0 = scmp.lt.u32.totalorder %s1516_s6, %s1974_s8 }
 0x16b   : > { %p1518_p6 = pnand %p1517_p1, %p2039_p3 }
 0x16c   : > { %p1523_p8 = por %p1522_p4, %p1521_p5 }
 0x16d   : > { %p1519_p2 = pneg %p1518_p6 }
 0x16e   : > { %p1525_p12 = por %p1524_p0, %p1523_p8 }
 0x170   : > { %p1526_p13 = pnand %p1525_p12, %p1519_p2 }
 0x172   : > { %1529 = shalt.err (!%p1526_p13)
}
 0x173   : > { %s1595_s3 = smov 128   ;;  %s1596_s21 = smov 8  }
 0x174   : > { %1375 = dma.vmem_to_hbm [thread:$0]  (%p2039_p3), %s1976_s19, 256, %s1974_s8, %s1146_s12, %s1595_s3, %s1595_s3, %s1596_s21  }
 0x175 PF: > { %s1177_s15 = sand.u32 1, %s1568_s9   ;;  %p2040_p7 = scmp.ne.s32.totalorder %s2034_s24, 0 }
 0x176   : > { %p2041_p10 = scmp.ge.s32.totalorder %s1588_s14, 2  ;;  %s1178_s26 = scalar_lea.sflag [#allocation4], %s1177_s15 }
 0x178   : > { %p1385_p9 = pnand %p2041_p10, %p2040_p7 }
 0x17a   : > { %1563 = dma.done.wait (!%p1385_p9), %s1178_s26, 256  }
 0x17b   : > { %1565 = vsyncadd (!%p1385_p9), %s1178_s26, 4294967040  ;;  %s21_s14 = sadd.s32 1, %s1588_s14   ;;  %s2042_s9 = smov %s1572_s10 }
 0x17c   : > { %p18_p11 = scmp.ge.s32.totalorder %s21_s14, 4   ;;  %s2043_s10 = smov %s1576_s11 }
 0x17d   : > { %s2044_s11 = smov %s1668_s23  ;;  %s2045_s12 = smov %s1584_s13 }
 0x17e   : > { %s2046_s13 = smov %s2048_s17  ;;  %20 = sbr.rel (!%p18_p11) target bundleno = 8 (0x8), region = 86 }
 0x185   :  { %1183 = vsyncpa [#allocation3], 1 }
 0x186   :  { %1185 = vsyncpa [#allocation3 + $0x1], 1 }
 0x187   :  { %1186 = vsyncpa [#allocation6], 1 }
 0x188   :  { %1188 = vsyncpa [#allocation6 + $0x1], 1 }
 0x189   :  { %1189 = vsyncpa [#allocation4], 1 }
 0x18a   :  { %1191 = vsyncpa [#allocation4 + $0x1], 1 }

</bundles_post_ra>
